<compile_context>
chip_gen: v6e
topology: v6e:2x2x1
jax: 0.10.0
libtpu: 0.0.40
codegen_flags: <defaults>
</compile_context>

<pallas_src>
import jax
import jax.numpy as jnp
from jax.experimental import pallas as pl
from jax.experimental.pallas import tpu as pltpu


def _dma_copy_kernel(src_hbm_ref, dst_hbm_ref, sem):
    # Single whole-array HBM -> HBM DMA. No VMEM staging, no grid, no tiling.
    cp = pltpu.make_async_copy(src_hbm_ref, dst_hbm_ref, sem)
    cp.start()
    cp.wait()


@jax.jit
def _pallas_materialized_copy(arr):
    """Materialize an independent copy of `arr` via one HBM->HBM DMA."""
    return pl.pallas_call(
        _dma_copy_kernel,
        out_shape=jax.ShapeDtypeStruct(arr.shape, arr.dtype),
        in_specs=[pl.BlockSpec(memory_space=pl.ANY)],
        out_specs=pl.BlockSpec(memory_space=pl.ANY),
        scratch_shapes=[pltpu.SemaphoreType.DMA],
    )(arr)


def osi_gt_forward(context, x, *, materialize_copy=False):
    """Mirror of OSI_GT.forward(context, x) -> (x['obs']['context'], None).

    Default path is a zero-cost pass-through (the optimal "kernel" here is no
    kernel). Set materialize_copy=True to get a distinct output buffer via a
    single HBM->HBM DMA (e.g. as an explicit fusion / donation boundary).
    """
    gt_context = x["obs"]["context"]
    if not materialize_copy:
        return (gt_context, None)
    return (_pallas_materialized_copy(gt_context), None)


if __name__ == "__main__":
    key = jax.random.PRNGKey(0)
    B, S, D = 2, 8, 32

    k_ctx, k_gt, k_obs = jax.random.split(key, 3)

    # `context` argument (unused by forward, exactly as in PyTorch).
    context = jax.random.normal(k_ctx, (B, S, D), dtype=jnp.float32)

    # x is a dict; only x['obs']['context'] matters for the forward.
    x = {
        "obs": {
            "context": jax.random.normal(k_gt, (B, S, D), dtype=jnp.float32),
            "state": jax.random.normal(k_obs, (B, D), dtype=jnp.float32),
        }
    }

    # Fast (default) path: pure pass-through, no kernel at all.
    out_fast, aux_fast = osi_gt_forward(context, x)
    out_fast = jax.block_until_ready(out_fast)
    assert aux_fast is None
    assert out_fast.shape == (B, S, D)
    assert jnp.array_equal(out_fast, x["obs"]["context"])

    # Materialized-copy path: single HBM->HBM DMA through Pallas.
    out_copy, aux_copy = osi_gt_forward(context, x, materialize_copy=True)
    out_copy = jax.block_until_ready(out_copy)
    assert aux_copy is None
    assert out_copy.shape == (B, S, D)
    assert out_copy.dtype == x["obs"]["context"].dtype
    assert jnp.array_equal(out_copy, x["obs"]["context"])

    print("KERNEL_OK")
</pallas_src>

<mosaic_0001>
module attributes {stable_mosaic.version = 11 : i64} {
  func.func @_dma_copy_kernel(%arg0: memref<2x8x32xf32, #tpu.memory_space<any>>, %arg1: memref<2x8x32xf32, #tpu.memory_space<any>>, %arg2: memref<!tpu.dma_semaphore, #tpu.memory_space<semaphore_mem>>) attributes {dimension_semantics = [], scalar_prefetch = 0 : i64, scratch_operands = 1 : i64, tpu.core_type = #tpu.core_type<tc>} {
    tpu.enqueue_dma source(%arg0 : memref<2x8x32xf32, #tpu.memory_space<any>>) target(%arg1 : memref<2x8x32xf32, #tpu.memory_space<any>>) target_semaphore(%arg2 : memref<!tpu.dma_semaphore, #tpu.memory_space<semaphore_mem>>)
    tpu.wait_dma2 semaphore(%arg2 : memref<!tpu.dma_semaphore, #tpu.memory_space<semaphore_mem>>) src(%arg0 : memref<2x8x32xf32, #tpu.memory_space<any>>) dst(%arg1 : memref<2x8x32xf32, #tpu.memory_space<any>>)
    return
  }
}

</mosaic_0001>

<bundles_post_ra>
// kernel: _pallas_materialized_copy.1
= control target key start
LH: loop header
LB: loop body
LE: loop exit
PB: predicated region body
PF: predicated region fallthrough
CT: control target
= control target key end

     0   :  { %s29_s6 = smov [#allocation2]   ;;  %s30_s7 = smov 131072   ;;  %s48_s0 = inlined_call_operand.hbm [shape: f32[2,8,32], index: 0, kind: input, shape index: {}]   ;;  %s49_s1 = inlined_call_operand.hbm [shape: f32[2,8,32], index: 1, kind: output, shape index: {}]  }
   0x1   :  { %s31_s8 = smov 0  }
   0x2   :  { %12 = dma.general %s48_s0, 256, %s49_s1, %s29_s6, %s30_s7, [#allocation4], %s31_s8, 0  }
   0x3   :  { %27 = dma.done.wait [#allocation2], 256 }
   0x4   :  { %28 = vsyncadd [#allocation2], 4294967040 }
   0x5   :  { %17 = vsyncmov [#allocation2] }
   0x8   :  { %s18_s13 = vpop.sfrf %17 }
   0x9   :  { %p23_p0 = scmp.ne.s32.totalorder %s18_s13, 0 }
   0xb   :  { %22 = shalt.err (%p23_p0)  }

</bundles_post_ra>
